<compile_context>
chip_gen: v7x
topology: tpu7x:2x2x1
jax: 0.10.0
libtpu: 0.0.40
codegen_flags: <defaults>
</compile_context>

<pallas_src>
import jax
import jax.numpy as jnp
from jax.experimental import pallas as pl
from jax.experimental.pallas import tpu as pltpu  # noqa: F401

LANE = 128  # TPU lane width; all padded feature dims use this


def _round_up(v, m):
    return (v + m - 1) // m * m


# ---------------- Fused Pallas kernel (whole forward pass) ----------------

def make_fused_gnn_kernel(layout, f_out):
    """layout: tuple of (w_row_off, w_rows, b_row_off) static slab offsets.

    Kernel args: (a_ref, x_ref, p_ref, o_ref)
      a_ref : (N, N)     f32  normalized adjacency A_hat
      x_ref : (N, F_in)  f32  node features
      p_ref : (R, 128)   f32  packed parameter slab (all W/b, lane-padded)
      o_ref : (N, 128)   f32  lane-dense log_softmax (cols >= f_out are pad)
    """

    def kernel(a_ref, x_ref, p_ref, o_ref):
        a = a_ref[...]        # f32; no bf16 cast (latency-bound MXU at this size)
        h = x_ref[...]        # f32 activations, stay VMEM/vreg resident

        for (w_off, w_rows, b_off) in layout:
            # Static, sublane-aligned views into the single parameter slab.
            w = p_ref[pl.ds(w_off, w_rows), :]        # (w_rows, 128)
            b = p_ref[pl.ds(b_off, 1), :]             # (1, 128)
            # W and h are zero-padded in the unused lanes, so the padded
            # matmuls reproduce the unpadded GCN layer exactly.
            xw = jnp.dot(h, w, preferred_element_type=jnp.float32)     # (N,128)
            agg = jnp.dot(a, xw, preferred_element_type=jnp.float32)   # (N,128)
            h = jnp.maximum(agg + b, 0.0)    # bias + ReLU on VPU, f32
            # TODO(synk): F.dropout(p=args.dropout) skipped (p=0.0 / eval mode).

        # log_softmax over the real output features; pad lanes masked out so
        # they contribute nothing to max / exp-sum.  Store stays lane-dense.
        lane_idx = jax.lax.broadcasted_iota(jnp.int32, h.shape, dimension=1)
        hm = jnp.where(lane_idx < f_out, h, jnp.float32(-1e30))
        m = jnp.max(hm, axis=-1, keepdims=True)
        s = hm - m
        lse = jnp.log(jnp.sum(jnp.exp(s), axis=-1, keepdims=True))
        o_ref[...] = s - lse

    return kernel


# ---------------- Parameter packing + wrapper ----------------

def pack_params(params, input_dim, lane=LANE):
    """Pack all (W, b) into a single f32 slab of shape (R, lane).

    Per-layer block:
      rows [off        : off+rows  ) : W, zero-padded to (rows, lane)
      rows [off+rows   : off+rows+8) : bias in row 0, rest zero
    `rows` equals the width of the activations entering that layer
    (input_dim for layer 0, `lane` afterwards).  All offsets are multiples of
    8, so every in-kernel view is sublane-tile aligned.
    """
    assert input_dim % 8 == 0, "pad node features to a multiple of 8 first"
    blocks, layout = [], []
    off, k = 0, input_dim
    for (w, b) in params:
        f_in, f_out = w.shape
        rows = _round_up(k, 8)
        assert f_in <= rows and f_out <= lane
        wblk = jnp.zeros((rows, lane), jnp.float32).at[:f_in, :f_out].set(w)
        bblk = jnp.zeros((8, lane), jnp.float32).at[0, :f_out].set(b.reshape(-1))
        blocks += [wblk, bblk]
        layout.append((off, rows, off + rows))
        off += rows + 8
        k = lane  # activations are lane-padded after the first layer
    return jnp.concatenate(blocks, axis=0), tuple(layout)


def gnn_forward(x, a_hat, slab, layout, f_out):
    """Fused forward: all GCN layers + ReLU + log_softmax in one pallas_call."""
    n = x.shape[0]
    lane = slab.shape[1]

    # Advisory cost estimate for XLA scheduling of the fused custom call.
    flops = 0
    for (_, rows, _) in layout:
        flops += 2 * n * rows * lane      # h @ W
        flops += 2 * n * n * lane         # A_hat @ (hW)
    cost = pl.CostEstimate(
        flops=flops,
        transcendentals=n * lane + n,     # exp + log of log_softmax
        bytes_accessed=(a_hat.size + x.size + slab.size + n * lane) * 4,
    )

    out_padded = pl.pallas_call(
        make_fused_gnn_kernel(layout, f_out),
        out_shape=jax.ShapeDtypeStruct((n, lane), jnp.float32),
        in_specs=[
            pl.BlockSpec(a_hat.shape, lambda: (0, 0)),
            pl.BlockSpec(x.shape, lambda: (0, 0)),
            pl.BlockSpec(slab.shape, lambda: (0, 0)),
        ],
        out_specs=pl.BlockSpec((n, lane), lambda: (0, 0)),
        cost_estimate=cost,
    )(a_hat, x, slab)

    return out_padded[:, :f_out]   # layout plumbing only; kernel store is lane-dense


# ---------------- Glue: normalized adjacency, params, reference ----------------

def build_normalized_adjacency(edge_index, num_nodes):
    src, dst = edge_index[0], edge_index[1]
    a = jnp.zeros((num_nodes, num_nodes), dtype=jnp.float32)
    a = a.at[dst, src].add(1.0)             # duplicate edges SUM (PyG gcn_norm)
    a = a + jnp.eye(num_nodes, dtype=jnp.float32)          # self-loops
    deg = jnp.sum(a, axis=1)
    d_inv_sqrt = jnp.where(deg > 0, 1.0 / jnp.sqrt(deg), 0.0)
    return d_inv_sqrt[:, None] * a * d_inv_sqrt[None, :]


def init_params(key, input_dim, hidden_dim, output_dim, num_layers):
    dims = [input_dim] + [hidden_dim] * num_layers + [output_dim]
    params = []
    for i in range(len(dims) - 1):
        f_in, f_out = dims[i], dims[i + 1]
        key, wk = jax.random.split(key)
        limit = (6.0 / (f_in + f_out)) ** 0.5  # glorot (PyG GCNConv default)
        w = jax.random.uniform(wk, (f_in, f_out), jnp.float32, -limit, limit)
        b = jnp.zeros((f_out,), jnp.float32)
        params.append((w, b))
    return params


def reference_forward(x, a_hat, params):
    h = x
    for (w, b) in params:
        h = jnp.maximum(a_hat @ (h @ w) + b[None, :], 0.0)
    m = jnp.max(h, axis=-1, keepdims=True)
    s = h - m
    return s - jnp.log(jnp.sum(jnp.exp(s), axis=-1, keepdims=True))


if __name__ == "__main__":
    # args-equivalent config
    NUM_LAYERS = 2      # args.num_layers  -> builds NUM_LAYERS + 1 GCNConv layers
    HIDDEN = 32         # args.hidden_features
    INPUT_DIM = 16
    OUTPUT_DIM = 8
    N_NODES = 64
    N_EDGES = 128

    key = jax.random.PRNGKey(0)
    k_x, k_e, k_p = jax.random.split(key, 3)

    # node features
    x = jax.random.normal(k_x, (N_NODES, INPUT_DIM), jnp.float32)

    # random undirected edge_index [2, E] (symmetrized)
    e_src = jax.random.randint(k_e, (N_EDGES,), 0, N_NODES)
    e_dst = jax.random.randint(jax.random.fold_in(k_e, 1), (N_EDGES,), 0, N_NODES)
    edge_index = jnp.stack(
        [jnp.concatenate([e_src, e_dst]), jnp.concatenate([e_dst, e_src])], axis=0
    )

    a_hat = build_normalized_adjacency(edge_index, N_NODES)
    params = init_params(k_p, INPUT_DIM, HIDDEN, OUTPUT_DIM, NUM_LAYERS)
    slab, layout = pack_params(params, INPUT_DIM)

    out = gnn_forward(x, a_hat, slab, layout, OUTPUT_DIM)
    jax.block_until_ready(out)

    assert out.shape == (N_NODES, OUTPUT_DIM)
    # rows of log_softmax must exp-sum to 1
    assert jnp.allclose(jnp.sum(jnp.exp(out), axis=1), 1.0, atol=1e-4)
    # structural check against a pure-JAX reference (lenient: matmul precision
    # differences only; structural errors would be O(1))
    ref = reference_forward(x, a_hat, params)
    assert jnp.allclose(out, ref, atol=5e-2), float(jnp.max(jnp.abs(out - ref)))
    print("KERNEL_OK")
</pallas_src>

<mosaic_0001>
module attributes {stable_mosaic.version = 11 : i64} {
  func.func @kernel(%arg0: memref<64x64xf32, #tpu.memory_space<vmem>>, %arg1: memref<64x16xf32, #tpu.memory_space<vmem>>, %arg2: memref<296x128xf32, #tpu.memory_space<vmem>>, %arg3: memref<64x128xf32, #tpu.memory_space<vmem>>) attributes {dimension_semantics = [], scalar_prefetch = 0 : i64, scratch_operands = 0 : i64, tpu.core_type = #tpu.core_type<tc>} {
    %c0 = arith.constant 0 : index
    %c0_0 = arith.constant 0 : index
    %0 = vector.load %arg0[%c0, %c0_0] : memref<64x64xf32, #tpu.memory_space<vmem>>, vector<64x64xf32>
    %c0_1 = arith.constant 0 : index
    %c0_2 = arith.constant 0 : index
    %1 = vector.load %arg1[%c0_1, %c0_2] : memref<64x16xf32, #tpu.memory_space<vmem>>, vector<64x16xf32>
    %c0_3 = arith.constant 0 : index
    %c0_4 = arith.constant 0 : index
    %2 = vector.load %arg2[%c0_3, %c0_4] : memref<296x128xf32, #tpu.memory_space<vmem>>, vector<16x128xf32>
    %c16 = arith.constant 16 : index
    %c0_5 = arith.constant 0 : index
    %3 = vector.load %arg2[%c16, %c0_5] : memref<296x128xf32, #tpu.memory_space<vmem>>, vector<1x128xf32>
    %cst = arith.constant dense<0.000000e+00> : vector<64x128xf32>
    %4 = tpu.matmul %1, %2, %cst {dimension_numbers = #tpu.dot_dimension_numbers<[1], [0], [0], [1], [0, 0, 1, 1], [], []>} : vector<64x16xf32>, vector<16x128xf32>, vector<64x128xf32> -> vector<64x128xf32>
    %cst_6 = arith.constant dense<0.000000e+00> : vector<64x128xf32>
    %5 = tpu.matmul %0, %4, %cst_6 {dimension_numbers = #tpu.dot_dimension_numbers<[1], [0], [0], [1], [0, 0, 1, 1], [], []>} : vector<64x64xf32>, vector<64x128xf32>, vector<64x128xf32> -> vector<64x128xf32>
    %6 = vector.broadcast %3 : vector<1x128xf32> to vector<64x128xf32>
    %7 = arith.addf %5, %6 : vector<64x128xf32>
    %cst_7 = arith.constant 0.000000e+00 : f32
    %8 = vector.broadcast %cst_7 : f32 to vector<64x128xf32>
    %9 = arith.maximumf %7, %8 : vector<64x128xf32>
    %c24 = arith.constant 24 : index
    %c0_8 = arith.constant 0 : index
    %10 = vector.load %arg2[%c24, %c0_8] : memref<296x128xf32, #tpu.memory_space<vmem>>, vector<128x128xf32>
    %c152 = arith.constant 152 : index
    %c0_9 = arith.constant 0 : index
    %11 = vector.load %arg2[%c152, %c0_9] : memref<296x128xf32, #tpu.memory_space<vmem>>, vector<1x128xf32>
    %cst_10 = arith.constant dense<0.000000e+00> : vector<64x128xf32>
    %12 = tpu.matmul %9, %10, %cst_10 {dimension_numbers = #tpu.dot_dimension_numbers<[1], [0], [0], [1], [0, 0, 1, 1], [], []>} : vector<64x128xf32>, vector<128x128xf32>, vector<64x128xf32> -> vector<64x128xf32>
    %cst_11 = arith.constant dense<0.000000e+00> : vector<64x128xf32>
    %13 = tpu.matmul %0, %12, %cst_11 {dimension_numbers = #tpu.dot_dimension_numbers<[1], [0], [0], [1], [0, 0, 1, 1], [], []>} : vector<64x64xf32>, vector<64x128xf32>, vector<64x128xf32> -> vector<64x128xf32>
    %14 = vector.broadcast %11 : vector<1x128xf32> to vector<64x128xf32>
    %15 = arith.addf %13, %14 : vector<64x128xf32>
    %cst_12 = arith.constant 0.000000e+00 : f32
    %16 = vector.broadcast %cst_12 : f32 to vector<64x128xf32>
    %17 = arith.maximumf %15, %16 : vector<64x128xf32>
    %c160 = arith.constant 160 : index
    %c0_13 = arith.constant 0 : index
    %18 = vector.load %arg2[%c160, %c0_13] : memref<296x128xf32, #tpu.memory_space<vmem>>, vector<128x128xf32>
    %c288 = arith.constant 288 : index
    %c0_14 = arith.constant 0 : index
    %19 = vector.load %arg2[%c288, %c0_14] : memref<296x128xf32, #tpu.memory_space<vmem>>, vector<1x128xf32>
    %cst_15 = arith.constant dense<0.000000e+00> : vector<64x128xf32>
    %20 = tpu.matmul %17, %18, %cst_15 {dimension_numbers = #tpu.dot_dimension_numbers<[1], [0], [0], [1], [0, 0, 1, 1], [], []>} : vector<64x128xf32>, vector<128x128xf32>, vector<64x128xf32> -> vector<64x128xf32>
    %cst_16 = arith.constant dense<0.000000e+00> : vector<64x128xf32>
    %21 = tpu.matmul %0, %20, %cst_16 {dimension_numbers = #tpu.dot_dimension_numbers<[1], [0], [0], [1], [0, 0, 1, 1], [], []>} : vector<64x64xf32>, vector<64x128xf32>, vector<64x128xf32> -> vector<64x128xf32>
    %22 = vector.broadcast %19 : vector<1x128xf32> to vector<64x128xf32>
    %23 = arith.addf %21, %22 : vector<64x128xf32>
    %cst_17 = arith.constant 0.000000e+00 : f32
    %24 = vector.broadcast %cst_17 : f32 to vector<64x128xf32>
    %25 = arith.maximumf %23, %24 : vector<64x128xf32>
    %26 = tpu.iota {dimensions = array<i32: 1>} : vector<64x128xi32>
    %c8_i32 = arith.constant 8 : i32
    %27 = vector.broadcast %c8_i32 : i32 to vector<64x128xi32>
    %28 = arith.cmpi slt, %26, %27 : vector<64x128xi32>
    %cst_18 = arith.constant -1.000000e+30 : f32
    %29 = vector.broadcast %cst_18 : f32 to vector<64x128xf32>
    %30 = arith.select %28, %25, %29 : vector<64x128xi1>, vector<64x128xf32>
    %cst_19 = arith.constant dense<0xFF800000> : vector<64xf32>
    %31 = vector.multi_reduction <maximumf>, %30, %cst_19 [1] : vector<64x128xf32> to vector<64xf32>
    %32 = vector.shape_cast %31 : vector<64xf32> to vector<64x1xf32>
    %33 = vector.broadcast %32 : vector<64x1xf32> to vector<64x128xf32>
    %34 = arith.subf %30, %33 : vector<64x128xf32>
    %35 = math.exp %34 : vector<64x128xf32>
    %cst_20 = arith.constant dense<0.000000e+00> : vector<64xf32>
    %36 = vector.multi_reduction <add>, %35, %cst_20 [1] : vector<64x128xf32> to vector<64xf32>
    %37 = vector.shape_cast %36 : vector<64xf32> to vector<64x1xf32>
    %38 = math.log %37 : vector<64x1xf32>
    %39 = vector.broadcast %38 : vector<64x1xf32> to vector<64x128xf32>
    %40 = arith.subf %34, %39 : vector<64x128xf32>
    %c0_21 = arith.constant 0 : index
    %c0_22 = arith.constant 0 : index
    %41 = vector.load %arg3[%c0_21, %c0_22] : memref<64x128xf32, #tpu.memory_space<vmem>>, vector<64x128xf32>
    tpu.vector_store %arg3[%c0_21, %c0_22], %40 {strides = array<i32>} : memref<64x128xf32, #tpu.memory_space<vmem>>, vector<64x128xf32>,
    return
  }
}

</mosaic_0001>

<bundles_post_ra>
// kernel: tpu_custom_call.1
= control target key start
LH: loop header
LB: loop body
LE: loop exit
PB: predicated region body
PF: predicated region fallthrough
CT: control target
= control target key end

     0   :  { %8 = vsyncpa [#allocation3], 0  ;;  %s1657_s0 = inlined_call_operand.vmem [shape: f32[64,64], index: 0, kind: input, shape index: {}]   ;;  %s1658_s1 = inlined_call_operand.vmem [shape: f32[64,16], index: 1, kind: input, shape index: {}]   ;;  %s1659_s2 = inlined_call_operand.hbm [shape: f32[296,128], index: 2, kind: input, shape index: {}]   ;;  %s1660_s3 = inlined_call_operand.hbm [shape: f32[64,128], index: 3, kind: output, shape index: {}]  }
   0x1   :  { %9 = vsyncpa [#allocation4], 0  ;;  %s1443_s12 = smov [#allocation2]   ;;  %s1395_s16 = scalar_lea.hbm %s1659_s2, 4736 }
   0x2   :  { %s19_s13 = sshll.u32 %s1443_s12, 4  ;;  %p1396_p0 = scmp.ne.s32.totalorder %s1659_s2, %s1395_s16  ;;  %s20_s13 = int_to_ptr.vmem [resolvable:$true] %s19_s13 }
   0x3   :  { %p1399_p1 = scmp.lt.u32.totalorder %s1395_s16, %s1659_s2 }
   0x5   :  { %p1401_p2 = pnand %p1399_p1, %p1396_p0 }
   0x7   :  { %1404 = shalt.err (!%p1401_p2)
}
   0x8   :  { %s1405_s21 = scalar_lea.vmem %s20_s13, 4736  ;;  %p1410_p4 = scmp.lt.s32.totalorder %s20_s13, %s20_s13 }
   0x9   :  { %p1406_p3 = scmp.ne.s32.totalorder %s20_s13, %s1405_s21  ;;  %p1411_p5 = scmp.lt.s32.totalorder %s1405_s21, %s1405_s21 }
   0xb   :  { %p1412_p6 = por %p1411_p5, %p1410_p4 }
   0xd   :  { %p1413_p7 = pnand %p1412_p6, %p1406_p3 }
   0xf   :  { %1416 = shalt.err (!%p1413_p7)
}
  0x10   :  { %s1444_s22 = smov 128   ;;  %s1445_s23 = smov 8  }
  0x11   :  { %25 = dma.hbm_to_vmem [thread:$0]  %s1659_s2, 4736, %s20_s13, [#allocation3], %s1444_s22, %s1444_s22, %s1445_s23  }
  0x12   :  { %1439 = dma.done.wait [#allocation3], 4736  }
  0x13   :  { %1440 = vsyncadd [#allocation3], 4294962560  ;;  %vm48_vm0 = vcmask 130048   ;;  %v45_v0 = vld [vmem:[#allocation2] sm:$0xff]  ;;  %v46_v1 = vld [vmem:[#allocation2 + $0x8] sm:$0xff]  ;;  %vm182_vm1 = vcmask 523264  }
  0x14   :  { %v37_v2 = vld [vmem:[%s1658_s1] sm:$0xff]  ;;  %v1243_v3 = vpack.c.bf16 %v46_v1, %v45_v0  ;;  %v38_v4 = vld [vmem:[%s1658_s1 + $0x8] sm:$0xff]  ;;  %v39_v5 = vld [vmem:[%s1658_s1 + $0x10] sm:$0xff] }
  0x15   :  { %1059 = vmatprep.mubr.msk.f32.mxu0 %vm48_vm0, %v37_v2  ;;  %v40_v6 = vld [vmem:[%s1658_s1 + $0x18] sm:$0xff]  ;;  %v41_v7 = vld [vmem:[%s1658_s1 + $0x20] sm:$0xff]  ;;  %v42_v8 = vld [vmem:[%s1658_s1 + $0x28] sm:$0xff] }
  0x16   :  { %1244 = vmatprep.subr.bf16.mxu0 %v1243_v3  ;;  %v43_v9 = vld [vmem:[%s1658_s1 + $0x30] sm:$0xff]  ;;  %v44_v10 = vld [vmem:[%s1658_s1 + $0x38] sm:$0xff]  ;;  %v1517_v11 = vld [vmem:[%s1657_s0] sm:$0xff] }
  0x17   :  { %1246 = vmatpush3.bf16.msra.mxu0 %v1243_v3  ;;  %1087 = vmatprep.mubr.msk.f32.mxu1 %vm182_vm1, %v1517_v11  ;;  %v320_v12 = vld [vmem:[#allocation2 + $0x18] sm:$0xff]  ;;  %v321_v13 = vld [vmem:[#allocation2 + $0x20] sm:$0xff]  ;;  %v322_v14 = vld [vmem:[#allocation2 + $0x28] sm:$0xff] }
  0x18   :  { %v1263_v15 = vpack.c.bf16 %v321_v13, %v320_v12  ;;  %v323_v16 = vld [vmem:[#allocation2 + $0x30] sm:$0xff]  ;;  %v324_v18 = vld [vmem:[#allocation2 + $0x38] sm:$0xff]  ;;  %v325_v19 = vld [vmem:[#allocation2 + $0x40] sm:$0xff] }
  0x19   :  { %v1267_v17 = vpack.c.bf16 %v323_v16, %v322_v14  ;;  %v1271_v20 = vpack.c.bf16 %v325_v19, %v324_v18  ;;  %v326_v21 = vld [vmem:[#allocation2 + $0x48] sm:$0xff]  ;;  %v327_v22 = vld [vmem:[#allocation2 + $0x50] sm:$0xff]  ;;  %v328_v24 = vld [vmem:[#allocation2 + $0x58] sm:$0xff] }
  0x1a   :  { %1060 = vmatmul.mubr.msk.f32.vlgmr.msra.gmra.mrb[0].mxu0 %vm48_vm0, %v38_v4  ;;  %1264 = vmatprep.subr.bf16.mxu0 %v1263_v15  ;;  %v1275_v23 = vpack.c.bf16 %v327_v22, %v326_v21  ;;  %v329_v25 = vld [vmem:[#allocation2 + $0x60] sm:$0xff]  ;;  %v330_v27 = vld [vmem:[#allocation2 + $0x68] sm:$0xff]  ;;  %v331_v28 = vld [vmem:[#allocation2 + $0x70] sm:$0xff] }
  0x1b   :  { %1062 = vmatprep.mubr.msk.f32.mxu0 %vm48_vm0, %v39_v5  ;;  %1266 = vmatpush3.bf16.msra.mxu0 %v1263_v15  ;;  %v1279_v26 = vpack.c.bf16 %v329_v25, %v328_v24  ;;  %v1283_v29 = vpack.c.bf16 %v331_v28, %v330_v27  ;;  %v332_v30 = vld [vmem:[#allocation2 + $0x78] sm:$0xff]  ;;  %v333_v31 = vld [vmem:[#allocation2 + $0x80] sm:$0xff]  ;;  %v1524_v45 = vld [vmem:[%s1657_s0 + $0x8] sm:$0xff] }
  0x1c   :  { %1268 = vmatprep.subr.bf16.mxu0 %v1267_v17  ;;  %v1287_v32 = vpack.c.bf16 %v333_v31, %v332_v30  ;;  %v1529_v46 = vld [vmem:[%s1657_s0 + $0x10] sm:$0xff]  ;;  %v1538_v47 = vld [vmem:[%s1657_s0 + $0x18] sm:$0xff]  ;;  %v1543_v48 = vld [vmem:[%s1657_s0 + $0x20] sm:$0xff] }
  0x1d   :  { %v1552_v49 = vld [vmem:[%s1657_s0 + $0x28] sm:$0xff]  ;;  %v1557_v50 = vld [vmem:[%s1657_s0 + $0x30] sm:$0xff]  ;;  %v1566_v51 = vld [vmem:[%s1657_s0 + $0x38] sm:$0xff]  ;;  %s1446_s0 = smov [#allocation5]  }
  0x1e   :  { %1063 = vmatmul.mubr.msk.f32.gmra.mrb[2].mxu0 %vm48_vm0, %v40_v6  ;;  %v334_v52 = vld [vmem:[#allocation2 + $0x88] sm:$0xff]  ;;  %v335_v53 = vld [vmem:[#allocation2 + $0x90] sm:$0xff]  ;;  %s902_s2 = sshll.u32 %s1446_s0, 4  ;;  %s903_s2 = int_to_ptr.vmem [resolvable:$true] %s902_s2 }
  0x1f   :  { %1065 = vmatprep.mubr.msk.f32.mxu0 %vm48_vm0, %v41_v7  ;;  %1270 = vmatpush3.bf16.msra.mxu0 %v1267_v17  ;;  %v1291_v54 = vpack.c.bf16 %v335_v53, %v334_v52  ;;  %v922_v55 = vld [vmem:[#allocation2 + $0x10] ss:$0 sm:$0xff]  ;;  %v560_v27 = vld [vmem:[#allocation2 + $0xa8] sm:$0xff]  ;;  %v571_v53 = vld [vmem:[#allocation2 + $0x100] sm:$0xff]  ;;  %s1417_s4 = scalar_lea.vmem %s903_s2, 1024  ;;  %p1422_p9 = scmp.lt.s32.totalorder %s903_s2, %s903_s2 }
  0x20   :  { %1272 = vmatprep.subr.bf16.mxu0 %v1271_v20  ;;  %v561_v31 = vld [vmem:[#allocation2 + $0xb0] sm:$0xff]  ;;  %p1418_p8 = scmp.ne.s32.totalorder %s903_s2, %s1417_s4  ;;  %p1423_p10 = scmp.lt.s32.totalorder %s1417_s4, %s1417_s4 }
  0x22   :  { %1066 = vmatmul.mubr.msk.f32.gmra.mrb[4].mxu0 %vm48_vm0, %v42_v8  ;;  %p1424_p11 = por %p1423_p10, %p1422_p9 }
  0x23   :  { %1068 = vmatprep.mubr.msk.f32.mxu0 %vm48_vm0, %v43_v9  ;;  %1274 = vmatpush3.bf16.msra.mxu0 %v1271_v20 }
  0x24   :  { %1276 = vmatprep.subr.bf16.mxu0 %v1275_v23  ;;  %p1425_p12 = pnand %p1424_p11, %p1418_p8 }
  0x26   :  { %1069 = vmatmul.mubr.msk.f32.gmra.mrb[6].mxu0 %vm48_vm0, %v44_v10 }
  0x27   :  { %1278 = vmatpush3.bf16.msra.mxu0 %v1275_v23 }
  0x28   :  { %1280 = vmatprep.subr.bf16.mxu0 %v1279_v26 }
  0x2b   :  { %1282 = vmatpush3.bf16.msra.mxu0 %v1279_v26  ;;  %v559_v26 = vld [vmem:[#allocation2 + $0xa0] sm:$0xff] }
  0x2c   :  { %1284 = vmatprep.subr.bf16.mxu0 %v1283_v29  ;;  %v1311_v30 = vpack.c.bf16 %v560_v27, %v559_v26 }
  0x2f   :  { %1286 = vmatpush3.bf16.msra.mxu0 %v1283_v29 }
  0x30   :  { %1288 = vmatprep.subr.bf16.mxu0 %v1287_v32 }
  0x33   :  { %1290 = vmatpush3.bf16.msra.mxu0 %v1287_v32  ;;  %v562_v32 = vld [vmem:[#allocation2 + $0xb8] sm:$0xff] }
  0x34   :  { %1292 = vmatprep.subr.bf16.mxu0 %v1291_v54 }
  0x37   :  { %1294 = vmatpush3.bf16.msra.mxu0 %v1291_v54  ;;  %v572_v54 = vld [vmem:[#allocation2 + $0x108] sm:$0xff] }
  0xed   :  { %v1061_v33 = vpop.f32.mrb[0].mxu0 }
  0xee   :  { %v139_v34 = vpop.f32.mrb[1].mxu0 }
  0xef   :  { %v1247_v35 = vpack.c.bf16 %v1061_v33, %v139_v34  ;;  %v1315_v33 = vpack.c.bf16 %v562_v32, %v561_v31  ;;  %v563_v34 = vld [vmem:[#allocation2 + $0xc0] sm:$0xff]  ;;  %v798_v32 = vlaneseq }
  0xf1   :  { %v1064_v36 = vpop.f32.mrb[2].mxu0  ;;  %1248 = vmatprep.subr.bf16.mxu1 %v1247_v35 }
  0xf2   :  { %v149_v37 = vpop.f32.mrb[3].mxu0  ;;  %1250 = vmatpush3.bf16.msra.mxu1 %v1247_v35  ;;  %v564_v35 = vld [vmem:[#allocation2 + $0xc8] sm:$0xff] }
  0xf3   :  { %v1251_v38 = vpack.c.bf16 %v1064_v36, %v149_v37  ;;  %v1319_v36 = vpack.c.bf16 %v564_v35, %v563_v34  ;;  %v565_v37 = vld [vmem:[#allocation2 + $0xd0] sm:$0xff] }
  0xf5   :  { %v1067_v39 = vpop.f32.mrb[4].mxu0  ;;  %1252 = vmatprep.subr.bf16.mxu1 %v1251_v38 }
  0xf6   :  { %v159_v40 = vpop.f32.mrb[5].mxu0  ;;  %1254 = vmatpush3.bf16.msra.mxu1 %v1251_v38  ;;  %v566_v38 = vld [vmem:[#allocation2 + $0xd8] sm:$0xff] }
  0xf7   :  { %v1255_v41 = vpack.c.bf16 %v1067_v39, %v159_v40  ;;  %v1323_v39 = vpack.c.bf16 %v566_v38, %v565_v37  ;;  %v567_v40 = vld [vmem:[#allocation2 + $0xe0] sm:$0xff] }
  0xf9   :  { %v1070_v42 = vpop.f32.mrb[6].mxu0  ;;  %1256 = vmatprep.subr.bf16.mxu1 %v1255_v41 }
  0xfa   :  { %v169_v43 = vpop.f32.mrb[7].mxu0  ;;  %1258 = vmatpush3.bf16.msra.mxu1 %v1255_v41  ;;  %v568_v41 = vld [vmem:[#allocation2 + $0xe8] sm:$0xff] }
  0xfb   :  { %v1259_v44 = vpack.c.bf16 %v1070_v42, %v169_v43  ;;  %v1327_v42 = vpack.c.bf16 %v568_v41, %v567_v40  ;;  %v569_v43 = vld [vmem:[#allocation2 + $0xf0] sm:$0xff] }
  0xfd   :  { %1260 = vmatprep.subr.bf16.mxu1 %v1259_v44 }
  0xfe   :  { %1262 = vmatpush3.bf16.msra.mxu1 %v1259_v44  ;;  %v570_v44 = vld [vmem:[#allocation2 + $0xf8] sm:$0xff] }
  0xff   :  { %v1331_v52 = vpack.c.bf16 %v570_v44, %v569_v43 }
 0x101   :  { %1088 = vmatmul.mubr.msk.f32.vlgmr.msra.gmra.mrb[0].mxu1 %vm182_vm1, %v1524_v45 }
 0x102   :  { %1090 = vmatprep.mubr.msk.f32.mxu1 %vm182_vm1, %v1529_v46 }
 0x105   :  { %1091 = vmatmul.mubr.msk.f32.gmra.mrb[2].mxu1 %vm182_vm1, %v1538_v47 }
 0x106   :  { %1093 = vmatprep.mubr.msk.f32.mxu1 %vm182_vm1, %v1543_v48 }
 0x109   :  { %1094 = vmatmul.mubr.msk.f32.gmra.mrb[4].mxu1 %vm182_vm1, %v1552_v49 }
 0x10a   :  { %1096 = vmatprep.mubr.msk.f32.mxu1 %vm182_vm1, %v1557_v50 }
 0x10d   :  { %1097 = vmatmul.mubr.msk.f32.gmra.mrb[6].mxu1 %vm182_vm1, %v1566_v51 }
 0x10e   :  { %1159 = vmatprep.mubr.msk.f32.mxu1 %vm182_vm1, %v1517_v11 }
 0x1d4   :  { %v1089_v56 = vpop.f32.mrb[0].mxu1 }
 0x1d5   :  { %v279_v57 = vadd.f32 %v1089_v56, %v922_v55  ;;  %v273_v58 = vpop.f32.mrb[1].mxu1  ;;  %v573_v56 = vld [vmem:[#allocation2 + $0x110] sm:$0xff] }
 0x1d6   :  { %v274_v59 = vadd.f32 %v922_v55, %v273_v58 }
 0x1d7   :  { %v313_v62 = vmax.f32 %v279_v57, 0.0  ;;  %v574_v57 = vld [vmem:[#allocation2 + $0x118] sm:$0xff] }
 0x1d8   :  { %v312_v60 = vmax.f32 %v274_v59, 0.0  ;;  %v1092_v61 = vpop.f32.mrb[2].mxu1  ;;  %v1339_v58 = vpack.c.bf16 %v574_v57, %v573_v56  ;;  %v931_v59 = vld [vmem:[#allocation2 + $0x98] ss:$0 sm:$0xff] }
 0x1d9   :  { %v289_v63 = vadd.f32 %v1092_v61, %v922_v55  ;;  %v283_v0 = vpop.f32.mrb[3].mxu1 }
 0x1da   :  { %v284_v1 = vadd.f32 %v922_v55, %v283_v0  ;;  %1131 = vmatprep.mubr.f32.mxu0 %v312_v60 }
 0x1db   :  { %1132 = vmatmul.mubr.f32.vlgmr.msra.gmra.mrb[8].mxu0 %v313_v62  ;;  %v315_v4 = vmax.f32 %v289_v63, 0.0 }
 0x1dc   :  { %v314_v2 = vmax.f32 %v284_v1, 0.0  ;;  %v1095_v3 = vpop.f32.mrb[4].mxu1 }
 0x1dd   :  { %v299_v5 = vadd.f32 %v1095_v3, %v922_v55  ;;  %v293_v6 = vpop.f32.mrb[5].mxu1 }
 0x1de   :  { %v294_v7 = vadd.f32 %v922_v55, %v293_v6  ;;  %1134 = vmatprep.mubr.f32.mxu0 %v314_v2 }
 0x1df   :  { %1135 = vmatmul.mubr.f32.gmra.mrb[10].mxu0 %v315_v4  ;;  %v317_v10 = vmax.f32 %v299_v5, 0.0 }
 0x1e0   :  { %v316_v8 = vmax.f32 %v294_v7, 0.0  ;;  %v1098_v9 = vpop.f32.mrb[6].mxu1 }
 0x1e1   :  { %v309_v12 = vadd.f32 %v1098_v9, %v922_v55  ;;  %v303_v13 = vpop.f32.mrb[7].mxu1 }
 0x1e2   :  { %v304_v14 = vadd.f32 %v922_v55, %v303_v13  ;;  %1137 = vmatprep.mubr.f32.mxu0 %v316_v8  ;;  %v1335_v55 = vpack.c.bf16 %v572_v54, %v571_v53 }
 0x1e3   :  { %1138 = vmatmul.mubr.f32.gmra.mrb[12].mxu0 %v317_v10  ;;  %v319_v16 = vmax.f32 %v309_v12, 0.0 }
 0x1e4   :  { %v318_v15 = vmax.f32 %v304_v14, 0.0 }
 0x1e6   :  { %1140 = vmatprep.mubr.f32.mxu0 %v318_v15 }
 0x1e7   :  { %1141 = vmatmul.mubr.f32.gmra.mrb[14].mxu0 %v319_v16 }
 0x1e8   :  { %1231 = vmatprep.mubr.msk.f32.mxu0 %vm182_vm1, %v1517_v11 }
 0x2ae   :  { %v1133_v17 = vpop.f32.mrb[8].mxu0 }
 0x2af   :  { %v403_v18 = vpop.f32.mrb[9].mxu0 }
 0x2b0   :  { %v1295_v19 = vpack.c.bf16 %v1133_v17, %v403_v18 }
 0x2b2   :  { %v1136_v20 = vpop.f32.mrb[10].mxu0  ;;  %1296 = vmatprep.subr.bf16.mxu1 %v1295_v19 }
 0x2b3   :  { %v413_v21 = vpop.f32.mrb[11].mxu0  ;;  %1298 = vmatpush3.bf16.msra.mxu1 %v1295_v19 }
 0x2b4   :  { %v1299_v22 = vpack.c.bf16 %v1136_v20, %v413_v21 }
 0x2b6   :  { %v1139_v23 = vpop.f32.mrb[12].mxu0  ;;  %1300 = vmatprep.subr.bf16.mxu1 %v1299_v22 }
 0x2b7   :  { %v423_v24 = vpop.f32.mrb[13].mxu0  ;;  %1302 = vmatpush3.bf16.msra.mxu1 %v1299_v22 }
 0x2b8   :  { %v1303_v25 = vpack.c.bf16 %v1139_v23, %v423_v24 }
 0x2ba   :  { %v1142_v28 = vpop.f32.mrb[14].mxu0  ;;  %1304 = vmatprep.subr.bf16.mxu1 %v1303_v25 }
 0x2bb   :  { %v433_v29 = vpop.f32.mrb[15].mxu0  ;;  %1306 = vmatpush3.bf16.msra.mxu1 %v1303_v25 }
 0x2bc   :  { %v1307_v11 = vpack.c.bf16 %v1142_v28, %v433_v29 }
 0x2be   :  { %1308 = vmatprep.subr.bf16.mxu1 %v1307_v11 }
 0x2bf   :  { %1310 = vmatpush3.bf16.msra.mxu1 %v1307_v11 }
 0x2c0   :  { %1312 = vmatprep.subr.bf16.mxu1 %v1311_v30 }
 0x2c2   :  { %1160 = vmatmul.mubr.msk.f32.vlgmr.msra.gmra.mrb[8].mxu1 %vm182_vm1, %v1524_v45 }
 0x2c3   :  { %1162 = vmatprep.mubr.msk.f32.mxu1 %vm182_vm1, %v1529_v46  ;;  %1314 = vmatpush3.bf16.msra.mxu1 %v1311_v30 }
 0x2c4   :  { %1316 = vmatprep.subr.bf16.mxu1 %v1315_v33 }
 0x2c6   :  { %1163 = vmatmul.mubr.msk.f32.gmra.mrb[10].mxu1 %vm182_vm1, %v1538_v47 }
 0x2c7   :  { %1165 = vmatprep.mubr.msk.f32.mxu1 %vm182_vm1, %v1543_v48  ;;  %1318 = vmatpush3.bf16.msra.mxu1 %v1315_v33  ;;  %v799_v33 = vand.u32 127, %v798_v32 }
 0x2c8   :  { %1320 = vmatprep.subr.bf16.mxu1 %v1319_v36 }
 0x2c9   :  { %vm800_vm2 = vcmp.lt.s32.totalorder %v799_v33, 8 }
 0x2ca   :  { %1166 = vmatmul.mubr.msk.f32.gmra.mrb[12].mxu1 %vm182_vm1, %v1552_v49 }
 0x2cb   :  { %1168 = vmatprep.mubr.msk.f32.mxu1 %vm182_vm1, %v1557_v50  ;;  %1322 = vmatpush3.bf16.msra.mxu1 %v1319_v36 }
 0x2cc   :  { %1324 = vmatprep.subr.bf16.mxu1 %v1323_v39 }
 0x2ce   :  { %1169 = vmatmul.mubr.msk.f32.gmra.mrb[14].mxu1 %vm182_vm1, %v1566_v51 }
 0x2cf   :  { %1326 = vmatpush3.bf16.msra.mxu1 %v1323_v39 }
 0x2d0   :  { %1328 = vmatprep.subr.bf16.mxu1 %v1327_v42 }
 0x2d3   :  { %1330 = vmatpush3.bf16.msra.mxu1 %v1327_v42 }
 0x2d4   :  { %1332 = vmatprep.subr.bf16.mxu1 %v1331_v52 }
 0x2d7   :  { %1334 = vmatpush3.bf16.msra.mxu1 %v1331_v52 }
 0x2d8   :  { %1336 = vmatprep.subr.bf16.mxu1 %v1335_v55 }
 0x2db   :  { %1338 = vmatpush3.bf16.msra.mxu1 %v1335_v55 }
 0x2dc   :  { %1340 = vmatprep.subr.bf16.mxu1 %v1339_v58 }
 0x2df   :  { %1342 = vmatpush3.bf16.msra.mxu1 %v1339_v58 }
 0x395   :  { %v1161_v60 = vpop.f32.mrb[8].mxu1 }
 0x396   :  { %v518_v61 = vadd.f32 %v1161_v60, %v931_v59  ;;  %v512_v62 = vpop.f32.mrb[9].mxu1 }
 0x397   :  { %v513_v63 = vadd.f32 %v931_v59, %v512_v62 }
 0x398   :  { %v552_v2 = vmax.f32 %v518_v61, 0.0 }
 0x399   :  { %v551_v0 = vmax.f32 %v513_v63, 0.0  ;;  %v1164_v1 = vpop.f32.mrb[10].mxu1 }
 0x39a   :  { %v528_v3 = vadd.f32 %v1164_v1, %v931_v59  ;;  %v522_v4 = vpop.f32.mrb[11].mxu1 }
 0x39b   :  { %v523_v5 = vadd.f32 %v931_v59, %v522_v4  ;;  %1203 = vmatprep.mubr.f32.mxu1 %v551_v0 }
 0x39c   :  { %1204 = vmatmul.mubr.f32.vlgmr.msra.gmra.mrb[16].mxu1 %v552_v2  ;;  %v554_v8 = vmax.f32 %v528_v3, 0.0 }
 0x39d   :  { %v553_v6 = vmax.f32 %v523_v5, 0.0  ;;  %v1167_v7 = vpop.f32.mrb[12].mxu1 }
 0x39e   :  { %v538_v9 = vadd.f32 %v1167_v7, %v931_v59  ;;  %v532_v10 = vpop.f32.mrb[13].mxu1 }
 0x39f   :  { %v533_v12 = vadd.f32 %v931_v59, %v532_v10  ;;  %1206 = vmatprep.mubr.f32.mxu1 %v553_v6 }
 0x3a0   :  { %1207 = vmatmul.mubr.f32.gmra.mrb[18].mxu1 %v554_v8  ;;  %v556_v15 = vmax.f32 %v538_v9, 0.0 }
 0x3a1   :  { %v555_v13 = vmax.f32 %v533_v12, 0.0  ;;  %v1170_v14 = vpop.f32.mrb[14].mxu1 }
 0x3a2   :  { %v548_v16 = vadd.f32 %v1170_v14, %v931_v59  ;;  %v542_v17 = vpop.f32.mrb[15].mxu1 }
 0x3a3   :  { %v543_v18 = vadd.f32 %v931_v59, %v542_v17  ;;  %1209 = vmatprep.mubr.f32.mxu1 %v555_v13 }
 0x3a4   :  { %1210 = vmatmul.mubr.f32.gmra.mrb[20].mxu1 %v556_v15  ;;  %v558_v20 = vmax.f32 %v548_v16, 0.0 }
 0x3a5   :  { %v557_v19 = vmax.f32 %v543_v18, 0.0 }
 0x3a7   :  { %1212 = vmatprep.mubr.f32.mxu1 %v557_v19 }
 0x3a8   :  { %1213 = vmatmul.mubr.f32.gmra.mrb[22].mxu1 %v558_v20 }
 0x46f   :  { %v1205_v21 = vpop.f32.mrb[16].mxu1 }
 0x470   :  { %v642_v22 = vpop.f32.mrb[17].mxu1 }
 0x471   :  { %v1343_v23 = vpack.c.bf16 %v1205_v21, %v642_v22 }
 0x473   :  { %v1208_v24 = vpop.f32.mrb[18].mxu1  ;;  %1344 = vmatprep.subr.bf16.mxu0 %v1343_v23 }
 0x474   :  { %v652_v25 = vpop.f32.mrb[19].mxu1  ;;  %1346 = vmatpush3.bf16.msra.mxu0 %v1343_v23 }
 0x475   :  { %v1347_v26 = vpack.c.bf16 %v1208_v24, %v652_v25 }
 0x477   :  { %v1211_v27 = vpop.f32.mrb[20].mxu1  ;;  %1348 = vmatprep.subr.bf16.mxu0 %v1347_v26 }
 0x478   :  { %v662_v28 = vpop.f32.mrb[21].mxu1  ;;  %1350 = vmatpush3.bf16.msra.mxu0 %v1347_v26 }
 0x479   :  { %v1351_v29 = vpack.c.bf16 %v1211_v27, %v662_v28 }
 0x47b   :  { %v1214_v11 = vpop.f32.mrb[22].mxu1  ;;  %1352 = vmatprep.subr.bf16.mxu0 %v1351_v29 }
 0x47c   :  { %v672_v30 = vpop.f32.mrb[23].mxu1  ;;  %1354 = vmatpush3.bf16.msra.mxu0 %v1351_v29 }
 0x47d   :  { %v1355_v31 = vpack.c.bf16 %v1214_v11, %v672_v30 }
 0x47f   :  { %1356 = vmatprep.subr.bf16.mxu0 %v1355_v31 }
 0x480   :  { %1358 = vmatpush3.bf16.msra.mxu0 %v1355_v31 }
 0x483   :  { %1232 = vmatmul.mubr.msk.f32.vlgmr.msra.gmra.mrb[16].mxu0 %vm182_vm1, %v1524_v45  ;;  %v940_v45 = vld [vmem:[#allocation2 + $0x120] ss:$0 sm:$0xff] }
 0x484   :  { %1234 = vmatprep.mubr.msk.f32.mxu0 %vm182_vm1, %v1529_v46 }
 0x487   :  { %1235 = vmatmul.mubr.msk.f32.gmra.mrb[18].mxu0 %vm182_vm1, %v1538_v47 }
 0x488   :  { %1237 = vmatprep.mubr.msk.f32.mxu0 %vm182_vm1, %v1543_v48 }
 0x48b   :  { %1238 = vmatmul.mubr.msk.f32.gmra.mrb[20].mxu0 %vm182_vm1, %v1552_v49 }
 0x48c   :  { %1240 = vmatprep.mubr.msk.f32.mxu0 %vm182_vm1, %v1557_v50 }
 0x48f   :  { %1241 = vmatmul.mubr.msk.f32.gmra.mrb[22].mxu0 %vm182_vm1, %v1566_v51 }
 0x556   :  { %v1233_v34 = vpop.f32.mrb[16].mxu0 }
 0x557   :  { %v757_v46 = vadd.f32 %v1233_v34, %v940_v45  ;;  %v751_v35 = vpop.f32.mrb[17].mxu0 }
 0x558   :  { %v752_v36 = vadd.f32 %v940_v45, %v751_v35 }
 0x559   :  { %v791_v47 = vmax.f32 %v757_v46, 0.0 }
 0x55a   :  { %v1236_v37 = vpop.f32.mrb[18].mxu0  ;;  %v790_v48 = vmax.f32 %v752_v36, 0.0 }
 0x55b   :  { %v767_v38 = vadd.f32 %v1236_v37, %v940_v45  ;;  %v761_v39 = vpop.f32.mrb[19].mxu0  ;;  %v802_v49 = vsel %vm800_vm2, %v791_v47, -1e+30 }
 0x55c   :  { %v762_v40 = vadd.f32 %v940_v45, %v761_v39  ;;  %811 = vmax.xlane.f32.xlu0 %v802_v49  ;;  %v801_v52 = vsel %vm800_vm2, %v790_v48, -1e+30 }
 0x55d   :  { %v793_v50 = vmax.f32 %v767_v38, 0.0 }
 0x55e   :  { %v1239_v41 = vpop.f32.mrb[20].mxu0  ;;  %v792_v51 = vmax.f32 %v762_v40, 0.0 }
 0x55f   :  { %v777_v42 = vadd.f32 %v1239_v41, %v940_v45  ;;  %v771_v43 = vpop.f32.mrb[21].mxu0  ;;  %v804_v44 = vsel %vm800_vm2, %v793_v50, -1e+30 }
 0x560   :  { %v772_v53 = vadd.f32 %v940_v45, %v771_v43  ;;  %815 = vmax.xlane.f32.xlu1 %v804_v44  ;;  %809 = vmax.xlane.f32.xlu0 %v801_v52  ;;  %v803_v59 = vsel %vm800_vm2, %v792_v51, -1e+30 }
 0x561   :  { %v795_v54 = vmax.f32 %v777_v42, 0.0 }
 0x562   :  { %v794_v55 = vmax.f32 %v772_v53, 0.0  ;;  %v1242_v56 = vpop.f32.mrb[22].mxu0 }
 0x563   :  { %v787_v57 = vadd.f32 %v1242_v56, %v940_v45  ;;  %v781_v58 = vpop.f32.mrb[23].mxu0  ;;  %v806_v63 = vsel %vm800_vm2, %v795_v54, -1e+30 }
 0x564   :  { %v782_v60 = vadd.f32 %v940_v45, %v781_v58  ;;  %813 = vmax.xlane.f32.xlu1 %v803_v59  ;;  %v805_v61 = vsel %vm800_vm2, %v794_v55, -1e+30 }
 0x565   :  { %v797_v62 = vmax.f32 %v787_v57, 0.0  ;;  %817 = vmax.xlane.f32.xlu0 %v805_v61 }
 0x566   :  { %v796_v0 = vmax.f32 %v782_v60, 0.0 }
 0x567   :  { %v808_v2 = vsel %vm800_vm2, %v797_v62, -1e+30 }
 0x568   :  { %819 = vmax.xlane.f32.xlu1 %v806_v63  ;;  %v807_v1 = vsel %vm800_vm2, %v796_v0, -1e+30 }
 0x569   :  { %821 = vmax.xlane.f32.xlu0 %v807_v1 }
 0x56c   :  { %823 = vmax.xlane.f32.xlu1 %v808_v2 }
 0x5e9   :  { %v812_v3 = vpop.xlane.xlu0 %811 }
 0x5ea   :  { %v1610_v4 = vsub.f32 %v802_v49, %v812_v3 }
 0x5ec   :  { %v835_v5 = vmul.f32 1.442695, %v1610_v4 }
 0x5ed   :  { %v816_v6 = vpop.xlane.xlu1 %815  ;;  %v810_v7 = vpop.xlane.xlu0 %809 }
 0x5ee   :  { %1363 = vpow2.f32 %v835_v5  ;;  %v1613_v8 = vsub.f32 %v804_v44, %v816_v6  ;;  %v1615_v9 = vsub.f32 %v801_v52, %v810_v7 }
 0x5f0   :  { %v839_v10 = vmul.f32 1.442695, %v1613_v8  ;;  %v833_v12 = vmul.f32 1.442695, %v1615_v9 }
 0x5f1   :  { %v814_v13 = vpop.xlane.xlu1 %813 }
 0x5f2   :  { %1365 = vpow2.f32 %v839_v10  ;;  %v1619_v14 = vsub.f32 %v803_v59, %v814_v13  ;;  %v818_v15 = vpop.xlane.xlu0 %817 }
 0x5f3   :  { %1367 = vpow2.f32 %v833_v12  ;;  %v1621_v16 = vsub.f32 %v805_v61, %v818_v15 }
 0x5f4   :  { %v837_v17 = vmul.f32 1.442695, %v1619_v14 }
 0x5f5   :  { %v820_v18 = vpop.xlane.xlu1 %819  ;;  %v841_v21 = vmul.f32 1.442695, %v1621_v16 }
 0x5f6   :  { %1369 = vpow2.f32 %v837_v17  ;;  %v1624_v19 = vsub.f32 %v806_v63, %v820_v18  ;;  %v822_v20 = vpop.xlane.xlu0 %821 }
 0x5f7   :  { %v1627_v22 = vsub.f32 %v807_v1, %v822_v20 }
 0x5f8   :  { %v1364_v23 = vpop.eup %1363  ;;  %v843_v24 = vmul.f32 1.442695, %v1624_v19 }
 0x5f9   :  { %851 = vadd.xlane.f32.xlu1 %v1364_v23  ;;  %v824_v25 = vpop.xlane.xlu1 %823  ;;  %v845_v27 = vmul.f32 1.442695, %v1627_v22 }
 0x5fa   :  { %1371 = vpow2.f32 %v843_v24  ;;  %v1630_v26 = vsub.f32 %v808_v2, %v824_v25 }
 0x5fb   :  { %1373 = vpow2.f32 %v841_v21 }
 0x5fc   :  { %v1366_v28 = vpop.eup %1365  ;;  %v847_v29 = vmul.f32 1.442695, %v1630_v26 }
 0x5fd   :  { %v1368_v11 = vpop.eup %1367  ;;  %855 = vadd.xlane.f32.xlu1 %v1366_v28 }
 0x5fe   :  { %1375 = vpow2.f32 %v847_v29  ;;  %849 = vadd.xlane.f32.xlu0 %v1368_v11 }
 0x5ff   :  { %1377 = vpow2.f32 %v845_v27 }
 0x600   :  { %v1370_v30 = vpop.eup %1369 }
 0x602   :  { %853 = vadd.xlane.f32.xlu0 %v1370_v30 }
 0x604   :  { %v1372_v31 = vpop.eup %1371 }
 0x605   :  { %v1374_v32 = vpop.eup %1373  ;;  %859 = vadd.xlane.f32.xlu1 %v1372_v31 }
 0x606   :  { %857 = vadd.xlane.f32.xlu0 %v1374_v32 }
 0x608   :  { %v1376_v45 = vpop.eup %1375 }
 0x609   :  { %v1378_v33 = vpop.eup %1377  ;;  %863 = vadd.xlane.f32.xlu1 %v1376_v45 }
 0x60a   :  { %861 = vadd.xlane.f32.xlu0 %v1378_v33 }
 0x686   :  { %v852_v34 = vpop.xlane.xlu1 %851 }
 0x687   :  { %1379 = vlog2.f32 %v852_v34 }
 0x68a   :  { %v856_v46 = vpop.xlane.xlu1 %855 }
 0x68b   :  { %1381 = vlog2.f32 %v856_v46  ;;  %v850_v35 = vpop.xlane.xlu0 %849 }
 0x68c   :  { %1383 = vlog2.f32 %v850_v35 }
 0x68f   :  { %v854_v36 = vpop.xlane.xlu0 %853 }
 0x690   :  { %1385 = vlog2.f32 %v854_v36 }
 0x691   :  { %v1380_v47 = vpop.eup %1379 }
 0x692   :  { %v868_v37 = vmul.f32 0.6931472, %v1380_v47  ;;  %v860_v48 = vpop.xlane.xlu1 %859 }
 0x693   :  { %1387 = vlog2.f32 %v860_v48  ;;  %v858_v38 = vpop.xlane.xlu0 %857 }
 0x694   :  { %v882_v39 = vsub.f32 %v1610_v4, %v868_v37  ;;  %1389 = vlog2.f32 %v858_v38 }
 0x695   :  { %v1382_v49 = vpop.eup %1381 }
 0x696   :  { %v1384_v40 = vpop.eup %1383  ;;  %890 = vst [vmem:[#allocation5 + $0x8] sm:$0xff] %v882_v39  ;;  %v872_v50 = vmul.f32 0.6931472, %v1382_v49  ;;  %v864_v41 = vpop.xlane.xlu1 %863 }
 0x697   :  { %v866_v51 = vmul.f32 0.6931472, %v1384_v40  ;;  %1391 = vlog2.f32 %v864_v41  ;;  %v862_v42 = vpop.xlane.xlu0 %861 }
 0x698   :  { %v884_v43 = vsub.f32 %v1613_v8, %v872_v50  ;;  %1393 = vlog2.f32 %v862_v42 }
 0x699   :  { %v881_v44 = vsub.f32 %v1615_v9, %v866_v51 }
 0x69a   :  { %v1386_v52 = vpop.eup %1385  ;;  %892 = vst [vmem:[#allocation5 + $0x18] sm:$0xff] %v884_v43 }
 0x69b   :  { %889 = vst [vmem:[#allocation5] sm:$0xff] %v881_v44  ;;  %v870_v53 = vmul.f32 0.6931472, %v1386_v52 }
 0x69d   :  { %v1388_v54 = vpop.eup %1387  ;;  %v883_v55 = vsub.f32 %v1619_v14, %v870_v53 }
 0x69e   :  { %v1390_v56 = vpop.eup %1389  ;;  %v876_v57 = vmul.f32 0.6931472, %v1388_v54 }
 0x69f   :  { %891 = vst [vmem:[#allocation5 + $0x10] sm:$0xff] %v883_v55  ;;  %v874_v58 = vmul.f32 0.6931472, %v1390_v56 }
 0x6a0   :  { %v886_v59 = vsub.f32 %v1624_v19, %v876_v57 }
 0x6a1   :  { %v1392_v60 = vpop.eup %1391  ;;  %v885_v61 = vsub.f32 %v1621_v16, %v874_v58 }
 0x6a2   :  { %v1394_v62 = vpop.eup %1393  ;;  %894 = vst [vmem:[#allocation5 + $0x28] sm:$0xff] %v886_v59  ;;  %v880_v63 = vmul.f32 0.6931472, %v1392_v60 }
 0x6a3   :  { %893 = vst [vmem:[#allocation5 + $0x20] sm:$0xff] %v885_v61  ;;  %v878_v0 = vmul.f32 0.6931472, %v1394_v62 }
 0x6a4   :  { %v888_v1 = vsub.f32 %v1630_v26, %v880_v63 }
 0x6a5   :  { %v887_v2 = vsub.f32 %v1627_v22, %v878_v0 }
 0x6a6   :  { %896 = vst [vmem:[#allocation5 + $0x38] sm:$0xff] %v888_v1 }
 0x6a7   :  { %895 = vst [vmem:[#allocation5 + $0x30] sm:$0xff] %v887_v2 }
 0x6a8   :  { %1428 = shalt.err (!%p1425_p12)
}
 0x6a9   :  { %s1429_s7 = scalar_lea.hbm %s1660_s3, 1024 }
 0x6aa   :  { %p1430_p13 = scmp.ne.s32.totalorder %s1660_s3, %s1429_s7  ;;  %p1433_p0 = scmp.lt.u32.totalorder %s1429_s7, %s1660_s3 }
 0x6ac   :  { %p1435_p1 = pnand %p1433_p0, %p1430_p13 }
 0x6ae   :  { %1438 = shalt.err (!%p1435_p1)
}
 0x6af   :  { %908 = dma.vmem_to_hbm [thread:$0]  %s903_s2, 1024, %s1660_s3, [#allocation4], %s1444_s22, %s1444_s22, %s1445_s23  }
 0x6b0   :  { %1441 = dma.done.wait [#allocation4], 1024  }
 0x6b1   :  { %1442 = vsyncadd [#allocation4], 4294966272 }
 0x6b2   :  { %912 = vsyncpa [#allocation3], 1 }
 0x6b3   :  { %913 = vsyncpa [#allocation4], 1 }

</bundles_post_ra>
